<compile_context>
chip_gen: v7x
topology: tpu7x:2x2x1
jax: 0.10.0
libtpu: 0.0.40
codegen_flags: <defaults>
</compile_context>

<pallas_src>
import jax
import jax.numpy as jnp
from jax.experimental import pallas as pl
from jax.experimental.pallas import tpu as pltpu

_LANE = 128
_SUBLANE = 8
_PACK = _SUBLANE * _LANE  # 1024 batch elements per (8,128) f32 vreg


def _round_up(x, m):
    return ((x + m - 1) // m) * m


def _linear31_kernel(x_ref, w_ref, b_ref, o_ref):
    # x_ref: VMEM (3, 8, T)  -- feature x sublane x lane (batch packed (8, T))
    # w_ref: SMEM (3,)       -- scalar weights
    # b_ref: SMEM (1,)       -- scalar bias
    # o_ref: VMEM (8, T)     -- sublane+lane dense output slab (unmasked vst)
    y = (w_ref[0] * x_ref[0]
         + w_ref[1] * x_ref[1]
         + w_ref[2] * x_ref[2]
         + b_ref[0])
    o_ref[...] = y.astype(o_ref.dtype)


def linear_3_to_1(x, weight, bias, *, tile_batch=256 * 1024,
                  min_pallas_batch=65536):
    """Forward pass of nn.Linear(3, 1).

    Args:
      x:      (N, 3) float32
      weight: (1, 3) float32  (PyTorch layout: out_features x in_features)
      bias:   (1,)   float32
      tile_batch: batch elements per grid step (sweep parameter; rounded to a
        multiple of 1024 = 8 sublanes x 128 lanes; ~16 B HBM traffic/elem).
      min_pallas_batch: below this N, use a fused XLA op instead of Pallas
        (relayout + launch overhead dominates for tiny batches).
    Returns:
      (N, 1) float32
    """
    n, k = x.shape
    assert k == 3, "expected 3 input features"
    w = weight.reshape(3).astype(jnp.float32)
    b = bias.reshape(1).astype(jnp.float32)

    if n < min_pallas_batch:
        return (x.astype(jnp.float32) @ w.reshape(3, 1) + b).astype(x.dtype)

    # ---- tile / padding geometry -------------------------------------------
    # Minimum lane extent of the (8, L) batch slab, rounded to full lanes.
    lanes_min = max(_LANE, _round_up(pl.cdiv(n, _SUBLANE), _LANE))

    # Cap the double-buffered VMEM footprint (~256 B per lane column) well
    # below v7x's 64 MiB physical VMEM; v5e/v6e have 128 MiB so it's safe.
    vmem_cap = 48 * 1024 * 1024
    bytes_per_lane_dbuf = 2 * (3 * _SUBLANE + _SUBLANE) * 4   # in + out, f32
    max_tile_lanes = (vmem_cap // bytes_per_lane_dbuf) // _LANE * _LANE

    tile_batch = max(_PACK, (tile_batch // _PACK) * _PACK)    # enforce packing
    tile_lanes = min(tile_batch // _SUBLANE, max_tile_lanes)

    if tile_lanes >= lanes_min:
        # Whole batch fits in a single step.  If it's big enough, still split
        # into >= 2 steps so the "parallel" axis can shard across v7x's 2 TCs.
        if lanes_min < 2 * _LANE:
            tile_lanes = lanes_min
        else:
            tile_lanes = _round_up(pl.cdiv(lanes_min, 2), _LANE)

    grid_n = pl.cdiv(lanes_min, tile_lanes)
    l_pad = grid_n * tile_lanes
    n_pad = l_pad * _SUBLANE

    # ---- relayout -----------------------------------------------------------
    # (N, 3) -> (3, N) -> pad -> (3, 8, L).  Padded slots compute just `bias`
    # and are sliced away below; never reduce over the padded extent.
    # TODO(synk): callers that control the layout should feed x already as
    # (3, N_pad) / (3, 8, L) to skip this extra HBM pass (it ~triples traffic).
    x_t = x.T
    if n_pad != n:
        x_t = jnp.pad(x_t, ((0, 0), (0, n_pad - n)))
    x_t = x_t.reshape(3, _SUBLANE, l_pad)

    # VMEM actually needed (double-buffered in + out blocks) plus headroom.
    vmem_needed = bytes_per_lane_dbuf * tile_lanes + (1 << 20)
    vmem_limit = int(min(max(vmem_needed, 32 * 1024 * 1024), vmem_cap))

    out = pl.pallas_call(
        _linear31_kernel,
        out_shape=jax.ShapeDtypeStruct((_SUBLANE, l_pad), x.dtype),
        grid=(grid_n,),
        in_specs=[
            pl.BlockSpec((3, _SUBLANE, tile_lanes), lambda i: (0, 0, i)),   # x
            pl.BlockSpec(memory_space=pltpu.MemorySpace.SMEM),              # w
            pl.BlockSpec(memory_space=pltpu.MemorySpace.SMEM),              # b
        ],
        out_specs=pl.BlockSpec((_SUBLANE, tile_lanes), lambda i: (0, i)),
        compiler_params=pltpu.CompilerParams(
            dimension_semantics=("parallel",),
            vmem_limit_bytes=vmem_limit,
        ),
    )(x_t, w, b)

    # (8, L) slab maps batch index j == s * L + l, which is exactly the
    # row-major flattening -> reshape, slice off padding, return (N, 1).
    return out.reshape(n_pad)[:n].reshape(n, 1)


if __name__ == "__main__":
    key = jax.random.PRNGKey(0)
    kx, kw, kb, kx2, kx3 = jax.random.split(key, 5)

    # Parameter init mimicking nn.Linear(3, 1):
    # uniform(-1/sqrt(in_features), 1/sqrt(in_features))
    bound = 1.0 / jnp.sqrt(3.0)
    weight = jax.random.uniform(kw, (1, 3), jnp.float32, -bound, bound)
    bias = jax.random.uniform(kb, (1,), jnp.float32, -bound, bound)

    def ref_fn(xx):
        return xx @ weight.T + bias

    # Small batch of 3-feature inputs (module-scale); force the Pallas path.
    x = jax.random.normal(kx, (8, 3), jnp.float32)
    out = jax.block_until_ready(linear_3_to_1(x, weight, bias, min_pallas_batch=0))
    assert out.shape == (8, 1)
    assert jnp.allclose(out, ref_fn(x), atol=1e-5, rtol=1e-5)

    # Non-multiple-of-1024 batch with a tiny tile -> multi-step pipelined grid
    # (padding + slice-back exercised).
    x2 = jax.random.normal(kx2, (5000, 3), jnp.float32)
    out2 = jax.block_until_ready(
        linear_3_to_1(x2, weight, bias, tile_batch=1024, min_pallas_batch=0))
    assert out2.shape == (5000, 1)
    assert jnp.allclose(out2, ref_fn(x2), atol=1e-5, rtol=1e-5)

    # Default tile with a batch big enough to trigger the >=2-step split
    # heuristic (v7x two-TensorCore sharding path).
    x3 = jax.random.normal(kx3, (3000, 3), jnp.float32)
    out3 = jax.block_until_ready(linear_3_to_1(x3, weight, bias, min_pallas_batch=0))
    assert out3.shape == (3000, 1)
    assert jnp.allclose(out3, ref_fn(x3), atol=1e-5, rtol=1e-5)

    # Small-N XLA fallback path (default threshold) also matches.
    out_fb = jax.block_until_ready(linear_3_to_1(x, weight, bias))
    assert jnp.allclose(out_fb, ref_fn(x), atol=1e-5, rtol=1e-5)

    print("KERNEL_OK")
</pallas_src>

<mosaic_0001>
module attributes {stable_mosaic.version = 11 : i64} {
  func.func @_linear31_kernel(%arg0: i32, %arg1: memref<3x8x128xf32, #tpu.memory_space<vmem>>, %arg2: memref<3xf32, #tpu.memory_space<smem>>, %arg3: memref<1xf32, #tpu.memory_space<smem>>, %arg4: memref<8x128xf32, #tpu.memory_space<vmem>>) attributes {dimension_semantics = [#tpu.dimension_semantics<parallel>], iteration_bounds = array<i64: 1>, scalar_prefetch = 0 : i64, scratch_operands = 0 : i64, tpu.core_type = #tpu.core_type<tc>, window_params = [{transform_indices = @transform_0, window_bounds = array<i64: 3, 8, 128>}, {transform_indices = @transform_1, window_bounds = array<i64: 3>}, {transform_indices = @transform_2, window_bounds = array<i64: 1>}, {transform_indices = @transform_3, window_bounds = array<i64: 8, 128>}]} {
    %c0 = arith.constant 0 : index
    %0 = memref.load %arg2[%c0] : memref<3xf32, #tpu.memory_space<smem>>
    %c0_0 = arith.constant 0 : index
    %c0_1 = arith.constant 0 : index
    %c0_2 = arith.constant 0 : index
    %1 = vector.load %arg1[%c0_0, %c0_1, %c0_2] : memref<3x8x128xf32, #tpu.memory_space<vmem>>, vector<1x8x128xf32>
    %2 = vector.shape_cast %1 : vector<1x8x128xf32> to vector<8x128xf32>
    %3 = vector.broadcast %0 : f32 to vector<8x128xf32>
    %4 = arith.mulf %3, %2 : vector<8x128xf32>
    %c1 = arith.constant 1 : index
    %5 = memref.load %arg2[%c1] : memref<3xf32, #tpu.memory_space<smem>>
    %c1_3 = arith.constant 1 : index
    %c0_4 = arith.constant 0 : index
    %c0_5 = arith.constant 0 : index
    %6 = vector.load %arg1[%c1_3, %c0_4, %c0_5] : memref<3x8x128xf32, #tpu.memory_space<vmem>>, vector<1x8x128xf32>
    %7 = vector.shape_cast %6 : vector<1x8x128xf32> to vector<8x128xf32>
    %8 = vector.broadcast %5 : f32 to vector<8x128xf32>
    %9 = arith.mulf %8, %7 : vector<8x128xf32>
    %10 = arith.addf %4, %9 : vector<8x128xf32>
    %c2 = arith.constant 2 : index
    %11 = memref.load %arg2[%c2] : memref<3xf32, #tpu.memory_space<smem>>
    %c2_6 = arith.constant 2 : index
    %c0_7 = arith.constant 0 : index
    %c0_8 = arith.constant 0 : index
    %12 = vector.load %arg1[%c2_6, %c0_7, %c0_8] : memref<3x8x128xf32, #tpu.memory_space<vmem>>, vector<1x8x128xf32>
    %13 = vector.shape_cast %12 : vector<1x8x128xf32> to vector<8x128xf32>
    %14 = vector.broadcast %11 : f32 to vector<8x128xf32>
    %15 = arith.mulf %14, %13 : vector<8x128xf32>
    %16 = arith.addf %10, %15 : vector<8x128xf32>
    %c0_9 = arith.constant 0 : index
    %17 = memref.load %arg3[%c0_9] : memref<1xf32, #tpu.memory_space<smem>>
    %18 = vector.broadcast %17 : f32 to vector<8x128xf32>
    %19 = arith.addf %16, %18 : vector<8x128xf32>
    %c0_10 = arith.constant 0 : index
    %c0_11 = arith.constant 0 : index
    %20 = vector.load %arg4[%c0_10, %c0_11] : memref<8x128xf32, #tpu.memory_space<vmem>>, vector<8x128xf32>
    tpu.vector_store %arg4[%c0_10, %c0_11], %19 {strides = array<i32>} : memref<8x128xf32, #tpu.memory_space<vmem>>, vector<8x128xf32>,
    return
  }
  func.func @transform_0(%arg0: i32) -> (i32, i32, i32) {
    %c0_i32 = arith.constant 0 : i32
    %c0_i32_0 = arith.constant 0 : i32
    %c0_i32_1 = arith.constant 0 : i32
    return %c0_i32, %c0_i32_0, %arg0 : i32, i32, i32
  }
  func.func @transform_1(%arg0: i32) -> i32 {
    %c0_i32 = arith.constant 0 : i32
    %c0_i32_0 = arith.constant 0 : i32
    return %c0_i32 : i32
  }
  func.func @transform_2(%arg0: i32) -> i32 {
    %c0_i32 = arith.constant 0 : i32
    %c0_i32_0 = arith.constant 0 : i32
    return %c0_i32 : i32
  }
  func.func @transform_3(%arg0: i32) -> (i32, i32) {
    %c0_i32 = arith.constant 0 : i32
    %c0_i32_0 = arith.constant 0 : i32
    return %c0_i32, %arg0 : i32, i32
  }
}

</mosaic_0001>

<bundles_post_ra>
// kernel: tpu_custom_call.1
= control target key start
LH: loop header
LB: loop body
LE: loop exit
PB: predicated region body
PF: predicated region fallthrough
CT: control target
= control target key end

     0   :  { %9 = vsyncpa [#allocation4], 0  ;;  %s203_s0 = inlined_call_operand.hbm [shape: f32[3,8,128], index: 0, kind: input, shape index: {}]   ;;  %s204_s1 = inlined_call_operand.vmem [shape: f32[3], index: 1, kind: input, shape index: {}]   ;;  %s205_s2 = inlined_call_operand.<no memory space> [shape: f32[1], index: 2, kind: input, shape index: {}]   ;;  %s206_s3 = inlined_call_operand.hbm [shape: f32[8,128], index: 3, kind: output, shape index: {}]  }
   0x1   :  { %10 = vsyncpa [#allocation6], 0 }
   0x2   :  { %11 = vsyncpa [#allocation5], 0  ;;  %s148_s12 = smov [#allocation3]   ;;  %s30_s16 = sshll.u32 %s204_s1, 4  ;;  %s31_s16 = int_to_ptr.vmem [resolvable:$true] %s30_s16 }
   0x3   :  { %s17_s13 = sshll.u32 %s148_s12, 4  ;;  %s86_s19 = scalar_lea.hbm %s203_s0, 384  ;;  %s18_s13 = int_to_ptr.vmem [resolvable:$true] %s17_s13 }
   0x4   :  { %p87_p0 = scmp.ne.s32.totalorder %s203_s0, %s86_s19  ;;  %p90_p1 = scmp.lt.u32.totalorder %s86_s19, %s203_s0 }
   0x6   :  { %p92_p2 = pnand %p90_p1, %p87_p0 }
   0x8   :  { %95 = shalt.err (!%p92_p2)
}
   0x9   :  { %s96_s24 = scalar_lea.vmem %s18_s13, 384  ;;  %p101_p4 = scmp.lt.s32.totalorder %s18_s13, %s18_s13 }
   0xa   :  { %p97_p3 = scmp.ne.s32.totalorder %s18_s13, %s96_s24  ;;  %p102_p5 = scmp.lt.s32.totalorder %s96_s24, %s96_s24 }
   0xc   :  { %p103_p6 = por %p102_p5, %p101_p4 }
   0xe   :  { %p104_p7 = pnand %p103_p6, %p97_p3 }
  0x10   :  { %107 = shalt.err (!%p104_p7)
}
  0x11   :  { %s149_s1 = smov 128   ;;  %s150_s25 = smov 8  }
  0x12   :  { %23 = dma.hbm_to_vmem [thread:$0]  %s203_s0, 384, %s18_s13, [#allocation4], %s149_s1, %s149_s1, %s150_s25  }
  0x13   :  { %s108_s28 = scalar_lea.vmem %s31_s16, 16  ;;  %p113_p9 = scmp.lt.s32.totalorder %s31_s16, %s31_s16 }
  0x14   :  { %p109_p8 = scmp.ne.s32.totalorder %s31_s16, %s108_s28  ;;  %p114_p10 = scmp.lt.s32.totalorder %s108_s28, %s108_s28 }
  0x16   :  { %p115_p11 = por %p114_p10, %p113_p9 }
  0x18   :  { %p116_p12 = pnand %p115_p11, %p109_p8 }
  0x1a   :  { %119 = shalt.err (!%p116_p12)
}
  0x1b   :  { %s151_s29 = smov [#allocation7]  }
  0x1c   :  { %33 = dma.vmem_to_smem %s31_s16, 16, %s151_s29, [#allocation6]  }
  0x1d   :  { %142 = dma.done.wait [#allocation4], 384  }
  0x1e   :  { %143 = vsyncadd [#allocation4], 4294966912 }
  0x1f   :  { %144 = dma.done.wait [#allocation6], 16  }
  0x20   :  { %145 = vsyncadd [#allocation6], 4294967280 }
  0x21   :  { %42 = sfence }
  0x22   :  { %s43_s30 = sld [smem:[#allocation7]]  ;;  %s79_s4 = sld [smem:[#allocation7 + $0x1]]  ;;  %v44_v0 = vld [vmem:[#allocation3] sm:$0xff]  ;;  %v49_v1 = vld [vmem:[#allocation3 + $0x8] sm:$0xff]  ;;  %v55_v2 = vld [vmem:[#allocation3 + $0x10] sm:$0xff]  ;;  %v60_v10 = vstv %s205_s2 }
  0x23   :  { %s80_s5 = sld [smem:[#allocation7 + $0x2]]  ;;  %s152_s7 = smov [#allocation8]  }
  0x24   :  { %s69_s8 = sshll.u32 %s152_s7, 4  ;;  %s70_s8 = int_to_ptr.vmem [resolvable:$true] %s69_s8 }
  0x25   :  { %s120_s9 = scalar_lea.vmem %s70_s8, 128  ;;  %p125_p0 = scmp.lt.s32.totalorder %s70_s8, %s70_s8 }
  0x26   :  { %p121_p13 = scmp.ne.s32.totalorder %s70_s8, %s120_s9  ;;  %p126_p1 = scmp.lt.s32.totalorder %s120_s9, %s120_s9 }
  0x28   :  { %v45_v3 = vstv %s43_s30  ;;  %v50_v4 = vstv %s79_s4  ;;  %p127_p2 = por %p126_p1, %p125_p0 }
  0x29   :  { %v46_v5 = vmul.f32 %v45_v3, %v44_v0  ;;  %v51_v6 = vmul.f32 %v50_v4, %v49_v1  ;;  %v56_v7 = vstv %s80_s5 }
  0x2a   :  { %v57_v8 = vmul.f32 %v56_v7, %v55_v2  ;;  %p128_p3 = pnand %p127_p2, %p121_p13 }
  0x2b   :  { %v52_v9 = vadd.f32 %v51_v6, %v46_v5 }
  0x2d   :  { %v58_v11 = vadd.f32 %v57_v8, %v52_v9 }
  0x2f   :  { %v61_v12 = vadd.f32 %v60_v10, %v58_v11 }
  0x31   :  { %62 = vst [vmem:[#allocation8] sm:$0xff] %v61_v12 }
  0x32   :  { %131 = shalt.err (!%p128_p3)
}
  0x33   :  { %s132_s12 = scalar_lea.hbm %s206_s3, 128 }
  0x34   :  { %p133_p4 = scmp.ne.s32.totalorder %s206_s3, %s132_s12  ;;  %p136_p5 = scmp.lt.u32.totalorder %s132_s12, %s206_s3 }
  0x36   :  { %p138_p6 = pnand %p136_p5, %p133_p4 }
  0x38   :  { %141 = shalt.err (!%p138_p6)
}
  0x39   :  { %72 = dma.vmem_to_hbm [thread:$0]  %s70_s8, 128, %s206_s3, [#allocation5]  }
  0x3a   :  { %146 = dma.done.wait [#allocation5], 128  }
  0x3b   :  { %147 = vsyncadd [#allocation5], 4294967168 }
  0x3c   :  { %76 = vsyncpa [#allocation4], 1 }
  0x3d   :  { %77 = vsyncpa [#allocation5], 1 }
  0x3e   :  { %78 = vsyncpa [#allocation6], 1 }

</bundles_post_ra>
